<compile_context>
chip_gen: v5e
topology: v5e:2x2
jax: 0.10.0
libtpu: 0.0.40
codegen_flags: <defaults>
</compile_context>

<pallas_src>
import jax
import jax.numpy as jnp
from jax.experimental import pallas as pl
from jax.experimental.pallas import tpu as pltpu


def _round_up(a: int, b: int) -> int:
    return (a + b - 1) // b * b


def _rodt_kernel(onehot_ref, x_ref, o_ref):
    # onehot_ref: (N_pad, N_pad)  -- resident, onehot_T[j, i] = (perm[i] == j)
    # x_ref     : (TILE_B, N_pad) -- current batch tile of the flattened input
    # o_ref     : (TILE_B, N_pad) -- permuted output tile
    x = x_ref[...]
    oh = onehot_ref[...]
    if x.dtype == jnp.float32:
        # HIGHEST precision so the selected f32 values pass through the MXU's
        # bf16-pass decomposition exactly (one-hot 0/1 splits are exact, and the
        # splits of x re-sum exactly in the f32 accumulator).
        out = jnp.dot(x, oh, preferred_element_type=jnp.float32,
                      precision=jax.lax.Precision.HIGHEST)
    else:
        # bf16 x bf16 -> f32 accumulate: full-rate MXU and exact for a 0/1 one-hot
        # (each output is one bf16 value * 1.0 plus zeros).
        out = jnp.dot(x, oh, preferred_element_type=jnp.float32)
    o_ref[...] = out.astype(o_ref.dtype)


def make_permutation_onehot(permutator: jnp.ndarray, n: int, n_pad: int, dtype):
    """Init-time precompute of the transposed one-hot permutation matrix.

    onehot_T[j, i] = 1 iff perm[i] == j, zero-padded for i >= n / j >= n, so
    padded output columns are exactly zero and padded contraction rows never
    contribute. Built already transposed: no in-kernel XLU transpose needed.
    """
    perm = permutator.astype(jnp.int32)
    perm_p = jnp.full((n_pad,), -1, dtype=jnp.int32).at[:n].set(perm)
    rows = jax.lax.broadcasted_iota(jnp.int32, (n_pad, n_pad), 0)  # rows[j, i] = j
    return (rows == perm_p[None, :]).astype(dtype)                 # (n_pad, n_pad)


def rodt_construction(M: jnp.ndarray, permutator: jnp.ndarray,
                      *, tile_b: int | None = None,
                      force_pallas: bool = False) -> jnp.ndarray:
    """Pallas implementation of rODTConstruction.forward.

    M:          (B, n_cond, n_col) float32 or bfloat16 array
    permutator: (n_cond * n_col,)  int array (a permutation)
    returns:    (B, n_cond * n_col, 1), equal to M.reshape(B,-1,1)[:, permutator, :]
    """
    B = M.shape[0]
    x = M.reshape(B, -1)                # glue: row-major flatten, same as torch
    N = x.shape[1]

    # Tiny-problem fast path: at N << 128 the MXU tile is mostly padding and the
    # kernel-launch / pipeline-priming overhead dominates -> plain JAX gather wins.
    if not force_pallas and (N < 128 or B < 8):
        return jnp.take(x, permutator, axis=1).reshape(B, N, 1)

    n_pad = _round_up(max(N, 128), 128)

    # One-hot dtype: bf16 when the data is bf16 (halves the resident slab, full-rate
    # MXU); f32 when the data is f32 so the gather stays bit-exact with HIGHEST.
    oh_dtype = jnp.bfloat16 if M.dtype == jnp.bfloat16 else jnp.float32
    onehot_T = make_permutation_onehot(permutator, N, n_pad, oh_dtype)

    itemsize = jnp.dtype(M.dtype).itemsize
    onehot_bytes = n_pad * n_pad * jnp.dtype(oh_dtype).itemsize
    # Per batch-row of a tile: double-buffered input block + double-buffered output block.
    io_bytes_per_row = 2 * 2 * n_pad * itemsize

    if tile_b is None:
        # Size tiles for v7x first (64 MiB physical VMEM); also fine on v5e/v6e (128 MiB).
        budget = 56 << 20
        tile_b = 512
        while tile_b > 8 and onehot_bytes + tile_b * io_bytes_per_row > budget:
            tile_b //= 2
        tile_b = min(tile_b, _round_up(B, 8))
    tile_b = max(8, _round_up(int(tile_b), 8))
    b_pad = _round_up(B, tile_b)

    if (b_pad, n_pad) != (B, N):
        # Explicit zero-pad so sublane/lane padding never carries garbage (or NaN/Inf)
        # into the contraction dimension.
        x = jnp.pad(x, ((0, b_pad - B), (0, n_pad - N)))

    vmem_needed = onehot_bytes + tile_b * io_bytes_per_row + (4 << 20)
    vmem_limit = int(min(max(vmem_needed, 32 << 20), 60 << 20))

    grid = (b_pad // tile_b,)
    out = pl.pallas_call(
        _rodt_kernel,
        out_shape=jax.ShapeDtypeStruct((b_pad, n_pad), M.dtype),
        grid=grid,
        in_specs=[
            # Constant block index -> the one-hot stays VMEM-resident (DMA'd once).
            pl.BlockSpec((n_pad, n_pad), lambda i: (0, 0)),
            pl.BlockSpec((tile_b, n_pad), lambda i: (i, 0)),
        ],
        out_specs=pl.BlockSpec((tile_b, n_pad), lambda i: (i, 0)),
        compiler_params=pltpu.CompilerParams(
            dimension_semantics=("parallel",),   # batch tiles are independent (v7x megacore)
            vmem_limit_bytes=vmem_limit,
        ),
    )(onehot_T, x)

    return out[:B, :N].reshape(B, N, 1)   # glue: strip padding, add trailing singleton


if __name__ == "__main__":
    key = jax.random.PRNGKey(0)
    k_perm, k_m, k_perm2, k_m2 = jax.random.split(key, 4)

    # --- Test 1: module-sized small shapes (f32), forced through the Pallas kernel ---
    B, n_cond, n_col = 8, 4, 8
    N = n_cond * n_col
    permutator = jax.random.permutation(k_perm, N)             # fixed "parameter"
    M = jax.random.normal(k_m, (B, n_cond, n_col), dtype=jnp.float32)

    out = jax.block_until_ready(rodt_construction(M, permutator, force_pallas=True))
    ref = M.reshape(B, -1, 1)[:, permutator, :]
    assert out.shape == (B, N, 1), out.shape
    assert jnp.array_equal(out, ref), "f32 Pallas path mismatch vs reference gather"

    # Default dispatch (tiny-N fast path) must match too.
    out_fast = jax.block_until_ready(rodt_construction(M, permutator))
    assert jnp.array_equal(out_fast, ref), "fast-path mismatch vs reference gather"

    # --- Test 2: lane-aligned N, bf16 data, multi-step batch grid (grid=(4,)) ---
    B2, n_cond2, n_col2 = 32, 4, 32
    N2 = n_cond2 * n_col2
    permutator2 = jax.random.permutation(k_perm2, N2)
    M2 = jax.random.normal(k_m2, (B2, n_cond2, n_col2)).astype(jnp.bfloat16)

    out2 = jax.block_until_ready(
        rodt_construction(M2, permutator2, tile_b=8, force_pallas=True))
    ref2 = M2.reshape(B2, -1, 1)[:, permutator2, :]
    assert out2.shape == (B2, N2, 1), out2.shape
    assert jnp.array_equal(out2, ref2), "bf16 Pallas path mismatch vs reference gather"

    print("KERNEL_OK")
</pallas_src>

<mosaic_0001>
module attributes {stable_mosaic.version = 11 : i64} {
  func.func @_rodt_kernel(%arg0: i32, %arg1: memref<128x128xf32, #tpu.memory_space<vmem>>, %arg2: memref<8x128xf32, #tpu.memory_space<vmem>>, %arg3: memref<8x128xf32, #tpu.memory_space<vmem>>) attributes {dimension_semantics = [#tpu.dimension_semantics<parallel>], iteration_bounds = array<i64: 1>, scalar_prefetch = 0 : i64, scratch_operands = 0 : i64, tpu.core_type = #tpu.core_type<tc>, window_params = [{pipeline_mode = #tpu.pipeline_mode<synchronous>, transform_indices = @transform_0, window_bounds = array<i64: 128, 128>}, {transform_indices = @transform_1, window_bounds = array<i64: 8, 128>}, {transform_indices = @transform_2, window_bounds = array<i64: 8, 128>}]} {
    %c0 = arith.constant 0 : index
    %c0_0 = arith.constant 0 : index
    %0 = vector.load %arg2[%c0, %c0_0] : memref<8x128xf32, #tpu.memory_space<vmem>>, vector<8x128xf32>
    %c0_1 = arith.constant 0 : index
    %c0_2 = arith.constant 0 : index
    %1 = vector.load %arg1[%c0_1, %c0_2] : memref<128x128xf32, #tpu.memory_space<vmem>>, vector<128x128xf32>
    %cst = arith.constant dense<0.000000e+00> : vector<8x128xf32>
    %2 = tpu.matmul %0, %1, %cst {dimension_numbers = #tpu.dot_dimension_numbers<[1], [0], [0], [1], [0, 0, 1, 1], [], []>, precision = #tpu.contract_precision<fp32>} : vector<8x128xf32>, vector<128x128xf32>, vector<8x128xf32> -> vector<8x128xf32>
    %c0_3 = arith.constant 0 : index
    %c0_4 = arith.constant 0 : index
    %3 = vector.load %arg3[%c0_3, %c0_4] : memref<8x128xf32, #tpu.memory_space<vmem>>, vector<8x128xf32>
    tpu.vector_store %arg3[%c0_3, %c0_4], %2 {strides = array<i32>} : memref<8x128xf32, #tpu.memory_space<vmem>>, vector<8x128xf32>,
    return
  }
  func.func @transform_0(%arg0: i32) -> (i32, i32) {
    %c0_i32 = arith.constant 0 : i32
    %c0_i32_0 = arith.constant 0 : i32
    %c0_i32_1 = arith.constant 0 : i32
    return %c0_i32, %c0_i32_0 : i32, i32
  }
  func.func @transform_1(%arg0: i32) -> (i32, i32) {
    %c0_i32 = arith.constant 0 : i32
    %c0_i32_0 = arith.constant 0 : i32
    return %arg0, %c0_i32 : i32, i32
  }
  func.func @transform_2(%arg0: i32) -> (i32, i32) {
    %c0_i32 = arith.constant 0 : i32
    %c0_i32_0 = arith.constant 0 : i32
    return %arg0, %c0_i32 : i32, i32
  }
}

</mosaic_0001>

<bundles_post_ra>
// kernel: tpu_custom_call.1
= control target key start
LH: loop header
LB: loop body
LE: loop exit
PB: predicated region body
PF: predicated region fallthrough
CT: control target
= control target key end

     0   :  { %7 = vsyncpa [#allocation3], 0  ;;  %s769_s0 = inlined_call_operand.hbm [shape: f32[128,128], index: 0, kind: input, shape index: {}]   ;;  %s770_s1 = inlined_call_operand.hbm [shape: f32[8,128], index: 1, kind: input, shape index: {}]   ;;  %s771_s2 = inlined_call_operand.hbm [shape: f32[8,128], index: 2, kind: output, shape index: {}]  }
   0x1   :  { %8 = vsyncpa [#allocation6], 0 }
   0x2   :  { %9 = vsyncpa [#allocation4], 0  ;;  %s14_s11 = sshll.u32 %s769_s0, 4  ;;  %s502_s12 = smov [#allocation2]   ;;  %s15_s11 = int_to_ptr.hbm [resolvable:$true] %s14_s11 }
   0x3   :  { %s16_s13 = sshll.u32 %s502_s12, 4  ;;  %s28_s16 = sshll.u32 %s770_s1, 4  ;;  %s17_s13 = int_to_ptr.vmem [resolvable:$true] %s16_s13  ;;  %s29_s16 = int_to_ptr.hbm [resolvable:$true] %s28_s16 }
   0x4   :  { %s503_s17 = smov 128   ;;  %s504_s18 = smov 8  }
   0x5   :  { %22 = dma.hbm_to_vmem [thread:$0]  %s15_s11, 2048, %s17_s13, [#allocation3], %s503_s17, %s503_s17, %s504_s18  }
   0x6   :  { %s505_s19 = smov [#allocation5]  }
   0x7   :  { %s30_s20 = sshll.u32 %s505_s19, 4  ;;  %s31_s20 = int_to_ptr.vmem [resolvable:$true] %s30_s20 }
   0x8   :  { %33 = dma.hbm_to_vmem [thread:$0]  %s29_s16, 128, %s31_s20, [#allocation6]  }
   0x9   :  { %496 = dma.done.wait [#allocation3], 2048  }
   0xa   :  { %497 = vsyncadd [#allocation3], 4294965248 }
   0xb   :  { %498 = dma.done.wait [#allocation6], 128  }
   0xc   :  { %499 = vsyncadd [#allocation6], 4294967168  ;;  %v58_v0 = vld [vmem:[#allocation2 + $0x78] sm:$0xff]  ;;  %v57_v1 = vld [vmem:[#allocation2 + $0x70] sm:$0xff]  ;;  %s506_s0 = smov [#allocation7]   ;;  %s408_s23 = sshll.u32 %s771_s2, 4  ;;  %s409_s23 = int_to_ptr.hbm [resolvable:$true] %s408_s23 }
   0xd   :  { %v56_v2 = vld [vmem:[#allocation2 + $0x68] sm:$0xff]  ;;  %v528_v3 = vand.u32 4294901760, %v58_v0  ;;  %v530_v4 = vand.u32 4294901760, %v57_v1  ;;  %v55_v6 = vld [vmem:[#allocation2 + $0x60] sm:$0xff]  ;;  %v54_v7 = vld [vmem:[#allocation2 + $0x58] sm:$0xff]  ;;  %s406_s1 = sshll.u32 %s506_s0, 4  ;;  %s407_s1 = int_to_ptr.vmem [resolvable:$true] %s406_s1 }
   0xe   :  { %v532_v5 = vand.u32 4294901760, %v56_v2  ;;  %v53_v8 = vld [vmem:[#allocation2 + $0x50] sm:$0xff]  ;;  %v534_v9 = vand.u32 4294901760, %v55_v6  ;;  %v536_v10 = vand.u32 4294901760, %v54_v7  ;;  %v52_v12 = vld [vmem:[#allocation2 + $0x48] sm:$0xff]  ;;  %v51_v13 = vld [vmem:[#allocation2 + $0x40] sm:$0xff] }
   0xf   :  { %v538_v11 = vand.u32 4294901760, %v53_v8  ;;  %60 = vmatpush.msra.mxu0 %v528_v3  ;;  %v542_v14 = vsub.f32 %v58_v0, %v528_v3  ;;  %v545_v15 = vsub.f32 %v57_v1, %v530_v4  ;;  %v550_v17 = vand.u32 4294901760, %v52_v12  ;;  %v50_v18 = vld [vmem:[#allocation2 + $0x38] sm:$0xff]  ;;  %256 = vmatpush.msra.mxu3 %v528_v3  ;;  %v49_v26 = vld [vmem:[#allocation2 + $0x30] sm:$0xff]  ;;  %v48_v36 = vld [vmem:[#allocation2 + $0x28] sm:$0xff] }
  0x10   :  { %v548_v16 = vsub.f32 %v56_v2, %v532_v5  ;;  %v554_v19 = vsub.f32 %v55_v6, %v534_v9  ;;  %v557_v20 = vsub.f32 %v54_v7, %v536_v10  ;;  %v566_v25 = vand.u32 4294901760, %v51_v13  ;;  %v47_v42 = vld [vmem:[#allocation2 + $0x20] sm:$0xff]  ;;  %v46_v47 = vld [vmem:[#allocation2 + $0x18] sm:$0xff]  ;;  %v45_v55 = vld [vmem:[#allocation2 + $0x10] sm:$0xff] }
  0x11   :  { %v560_v21 = vsub.f32 %v53_v8, %v538_v11  ;;  %62 = vmatpush.msra.mxu0 %v530_v4  ;;  %v102_v22 = vand.u32 4294901760, %v542_v14  ;;  %v108_v23 = vand.u32 4294901760, %v545_v15  ;;  %203 = vmatpush.msra.mxu2 %v542_v14  ;;  %v570_v28 = vand.u32 4294901760, %v50_v18  ;;  %v44_v60 = vld [vmem:[#allocation2 + $0x8] sm:$0xff]  ;;  %v43_v1 = vld [vmem:[#allocation2] sm:$0xff] }
  0x12   :  { %v114_v24 = vand.u32 4294901760, %v548_v16  ;;  %v120_v27 = vand.u32 4294901760, %v554_v19  ;;  %v573_v29 = vsub.f32 %v52_v12, %v550_v17  ;;  %258 = vmatpush.msra.mxu3 %v530_v4  ;;  %v126_v33 = vand.u32 4294901760, %v557_v20  ;;  %v42_v7 = vld [vmem:[#allocation5] sm:$0xff] }
  0x13   :  { %64 = vmatpush.msra.mxu0 %v532_v5  ;;  %v103_v30 = vsub.f32 %v542_v14, %v102_v22  ;;  %v109_v31 = vsub.f32 %v545_v15, %v108_v23  ;;  %206 = vmatpush.msra.mxu2 %v545_v15  ;;  %v132_v34 = vand.u32 4294901760, %v560_v21  ;;  %v589_v35 = vand.u32 4294901760, %v49_v26 }
  0x14   :  { %v115_v32 = vsub.f32 %v548_v16, %v114_v24  ;;  %260 = vmatpush.msra.mxu3 %v532_v5  ;;  %v121_v39 = vsub.f32 %v554_v19, %v120_v27  ;;  %v597_v40 = vsub.f32 %v51_v13, %v566_v25  ;;  %v138_v41 = vand.u32 4294901760, %v573_v29 }
  0x15   :  { %v104_v37 = vand.u32 4294901760, %v103_v30  ;;  %66 = vmatpush.msra.mxu0 %v534_v9  ;;  %v110_v38 = vand.u32 4294901760, %v109_v31  ;;  %209 = vmatpush.msra.mxu2 %v548_v16  ;;  %v127_v44 = vsub.f32 %v557_v20, %v126_v33  ;;  %v606_v45 = vand.u32 4294901760, %v48_v36 }
  0x16   :  { %262 = vmatpush.msra.mxu3 %v534_v9  ;;  %v116_v43 = vand.u32 4294901760, %v115_v32  ;;  %v609_v46 = vsub.f32 %v50_v18, %v570_v28  ;;  %v133_v48 = vsub.f32 %v560_v21, %v132_v34  ;;  %v122_v49 = vand.u32 4294901760, %v121_v39 }
  0x17   :  { %105 = vmatpush.msra.mxu1 %v104_v37  ;;  %68 = vmatpush.msra.mxu0 %v536_v10  ;;  %v144_v50 = vand.u32 4294901760, %v597_v40  ;;  %v618_v51 = vand.u32 4294901760, %v47_v42  ;;  %v621_v52 = vsub.f32 %v49_v26, %v589_v35  ;;  %v139_v53 = vsub.f32 %v573_v29, %v138_v41 }
  0x18   :  { %212 = vmatpush.msra.mxu2 %v554_v19  ;;  %264 = vmatpush.msra.mxu3 %v536_v10  ;;  %v626_v54 = vand.u32 4294901760, %v46_v47  ;;  %v128_v56 = vand.u32 4294901760, %v127_v44  ;;  %v150_v57 = vand.u32 4294901760, %v609_v46  ;;  %v633_v58 = vsub.f32 %v48_v36, %v606_v45 }
  0x19   :  { %111 = vmatpush.msra.mxu1 %v110_v38  ;;  %70 = vmatpush.msra.mxu0 %v538_v11  ;;  %v134_v59 = vand.u32 4294901760, %v133_v48  ;;  %v145_v61 = vsub.f32 %v597_v40, %v144_v50  ;;  %v156_v62 = vand.u32 4294901760, %v621_v52  ;;  %v642_v63 = vand.u32 4294901760, %v45_v55 }
  0x1a   :  { %215 = vmatpush.msra.mxu2 %v557_v20  ;;  %266 = vmatpush.msra.mxu3 %v538_v11  ;;  %v645_v0 = vsub.f32 %v47_v42, %v618_v51  ;;  %v140_v2 = vand.u32 4294901760, %v139_v53  ;;  %v648_v6 = vsub.f32 %v46_v47, %v626_v54  ;;  %v151_v8 = vsub.f32 %v609_v46, %v150_v57 }
  0x1b   :  { %117 = vmatpush.msra.mxu1 %v116_v43  ;;  %72 = vmatpush.msra.mxu0 %v550_v17  ;;  %v162_v12 = vand.u32 4294901760, %v633_v58  ;;  %v657_v13 = vand.u32 4294901760, %v44_v60  ;;  %v659_v18 = vand.u32 4294901760, %v42_v7  ;;  %v661_v26 = vand.u32 4294901760, %v43_v1 }
  0x1c   :  { %218 = vmatpush.msra.mxu2 %v560_v21  ;;  %268 = vmatpush.msra.mxu3 %v550_v17  ;;  %v146_v30 = vand.u32 4294901760, %v145_v61  ;;  %v157_v31 = vsub.f32 %v621_v52, %v156_v62  ;;  %v168_v32 = vand.u32 4294901760, %v645_v0  ;;  %v671_v36 = vsub.f32 %v45_v55, %v642_v63 }
  0x1d   :  { %123 = vmatpush.msra.mxu1 %v122_v49  ;;  %74 = vmatpush.msra.mxu0 %v566_v25  ;;  %v174_v37 = vand.u32 4294901760, %v648_v6  ;;  %v152_v38 = vand.u32 4294901760, %v151_v8  ;;  %v163_v39 = vsub.f32 %v633_v58, %v162_v12  ;;  %v681_v42 = vsub.f32 %v44_v60, %v657_v13 }
  0x1e   :  { %221 = vmatpush.msra.mxu2 %v573_v29  ;;  %270 = vmatpush.msra.mxu3 %v566_v25  ;;  %v92_v43 = vsub.f32 %v42_v7, %v659_v18  ;;  %v158_v44 = vand.u32 4294901760, %v157_v31  ;;  %v169_v47 = vsub.f32 %v645_v0, %v168_v32  ;;  %v180_v48 = vand.u32 4294901760, %v671_v36 }
  0x1f   :  { %129 = vmatpush.msra.mxu1 %v128_v56  ;;  %76 = vmatpush.msra.mxu0 %v570_v28  ;;  %v692_v49 = vsub.f32 %v43_v1, %v661_v26  ;;  %v164_v53 = vand.u32 4294901760, %v163_v39  ;;  %v175_v55 = vsub.f32 %v648_v6, %v174_v37  ;;  %v186_v56 = vand.u32 4294901760, %v681_v42 }
  0x20   :  { %224 = vmatpush.msra.mxu2 %v597_v40  ;;  %272 = vmatpush.msra.mxu3 %v570_v28  ;;  %v170_v60 = vand.u32 4294901760, %v169_v47  ;;  %v181_v61 = vsub.f32 %v671_v36, %v180_v48 }
  0x21   :  { %135 = vmatpush.msra.mxu1 %v134_v59  ;;  %78 = vmatpush.msra.mxu0 %v589_v35  ;;  %v93_v59 = vand.u32 4294901760, %v92_v43  ;;  %v192_v1 = vand.u32 4294901760, %v692_v49  ;;  %v187_v7 = vsub.f32 %v681_v42, %v186_v56 }
  0x22   :  { %227 = vmatpush.msra.mxu2 %v609_v46  ;;  %274 = vmatpush.msra.mxu3 %v589_v35 }
  0x23   :  { %141 = vmatpush.msra.mxu1 %v140_v2  ;;  %80 = vmatpush.msra.mxu0 %v606_v45  ;;  %v176_v2 = vand.u32 4294901760, %v175_v55  ;;  %v94_v8 = vsub.f32 %v92_v43, %v93_v59  ;;  %v193_v31 = vsub.f32 %v692_v49, %v192_v1 }
  0x24   :  { %230 = vmatpush.msra.mxu2 %v621_v52  ;;  %276 = vmatpush.msra.mxu3 %v606_v45 }
  0x25   :  { %147 = vmatpush.msra.mxu1 %v146_v30  ;;  %82 = vmatpush.msra.mxu0 %v618_v51  ;;  %v182_v30 = vand.u32 4294901760, %v181_v61  ;;  %v95_v39 = vand.u32 4294901760, %v94_v8 }
  0x26   :  { %233 = vmatpush.msra.mxu2 %v633_v58  ;;  %278 = vmatpush.msra.mxu3 %v618_v51 }
  0x27   :  { %153 = vmatpush.msra.mxu1 %v152_v38  ;;  %84 = vmatpush.msra.mxu0 %v626_v54  ;;  %v188_v38 = vand.u32 4294901760, %v187_v7 }
  0x28   :  { %236 = vmatpush.msra.mxu2 %v645_v0  ;;  %280 = vmatpush.msra.mxu3 %v626_v54 }
  0x29   :  { %159 = vmatpush.msra.mxu1 %v158_v44  ;;  %86 = vmatpush.msra.mxu0 %v642_v63  ;;  %v194_v44 = vand.u32 4294901760, %v193_v31 }
  0x2a   :  { %239 = vmatpush.msra.mxu2 %v648_v6  ;;  %282 = vmatpush.msra.mxu3 %v642_v63 }
  0x2b   :  { %165 = vmatpush.msra.mxu1 %v164_v53  ;;  %88 = vmatpush.msra.mxu0 %v657_v13 }
  0x2c   :  { %242 = vmatpush.msra.mxu2 %v671_v36  ;;  %284 = vmatpush.msra.mxu3 %v657_v13 }
  0x2d   :  { %171 = vmatpush.msra.mxu1 %v170_v60  ;;  %90 = vmatpush.msra.mxu0 %v661_v26 }
  0x2e   :  { %245 = vmatpush.msra.mxu2 %v681_v42  ;;  %286 = vmatpush.msra.mxu3 %v661_v26 }
  0x2f   :  { %297 = vmatpush.msrb.mxu0 %v102_v22  ;;  %177 = vmatpush.msra.mxu1 %v176_v2 }
  0x30   :  { %248 = vmatpush.msra.mxu2 %v692_v49  ;;  %290 = vmatmul.f32.vlgmr.msra.gmra.mxu3 %v93_v59 }
  0x31   :  { %301 = vmatpush.msrb.mxu0 %v108_v23  ;;  %183 = vmatpush.msra.mxu1 %v182_v30 }
  0x32   :  { %251 = vmatmul.f32.vlgmr.msra.gmra.mxu2 %v92_v43  ;;  %96 = vmatmul.f32.vlgmr.msra.gmra.mxu0 %v95_v39 }
  0x33   :  { %305 = vmatpush.msrb.mxu0 %v114_v24  ;;  %189 = vmatpush.msra.mxu1 %v188_v38 }
  0x35   :  { %309 = vmatpush.msrb.mxu0 %v120_v27  ;;  %195 = vmatpush.msra.mxu1 %v194_v44 }
  0x36   :  { %197 = vmatmul.f32.vlgmr.msra.gmra.mxu1 %v659_v18 }
  0x37   :  { %364 = vmatpush.msrb.mxu1 %v528_v3  ;;  %313 = vmatpush.msrb.mxu0 %v126_v33 }
  0x39   :  { %366 = vmatpush.msrb.mxu1 %v530_v4  ;;  %317 = vmatpush.msrb.mxu0 %v132_v34 }
  0x3b   :  { %368 = vmatpush.msrb.mxu1 %v532_v5  ;;  %321 = vmatpush.msrb.mxu0 %v138_v41 }
  0x3d   :  { %370 = vmatpush.msrb.mxu1 %v534_v9  ;;  %325 = vmatpush.msrb.mxu0 %v144_v50 }
  0x3f   :  { %372 = vmatpush.msrb.mxu1 %v536_v10  ;;  %329 = vmatpush.msrb.mxu0 %v150_v57 }
  0x41   :  { %374 = vmatpush.msrb.mxu1 %v538_v11  ;;  %333 = vmatpush.msrb.mxu0 %v156_v62 }
  0x43   :  { %376 = vmatpush.msrb.mxu1 %v550_v17  ;;  %337 = vmatpush.msrb.mxu0 %v162_v12 }
  0x45   :  { %378 = vmatpush.msrb.mxu1 %v566_v25  ;;  %341 = vmatpush.msrb.mxu0 %v168_v32 }
  0x47   :  { %380 = vmatpush.msrb.mxu1 %v570_v28  ;;  %345 = vmatpush.msrb.mxu0 %v174_v37 }
  0x49   :  { %382 = vmatpush.msrb.mxu1 %v589_v35  ;;  %349 = vmatpush.msrb.mxu0 %v180_v48 }
  0x4b   :  { %384 = vmatpush.msrb.mxu1 %v606_v45  ;;  %353 = vmatpush.msrb.mxu0 %v186_v56 }
  0x4d   :  { %386 = vmatpush.msrb.mxu1 %v618_v51  ;;  %357 = vmatpush.msrb.mxu0 %v192_v1 }
  0x4e   :  { %359 = vmatmul.f32.vlgmr.msrb.gmra.mxu0 %v659_v18 }
  0x4f   :  { %388 = vmatpush.msrb.mxu1 %v626_v54 }
  0x51   :  { %390 = vmatpush.msrb.mxu1 %v642_v63 }
  0x53   :  { %392 = vmatpush.msrb.mxu1 %v657_v13 }
  0x55   :  { %394 = vmatpush.msrb.mxu1 %v661_v26 }
  0x56   :  { %396 = vmatmul.f32.vlgmr.msrb.gmra.mxu1 %v659_v18 }
  0xaf   :  { %v97_v4 = vpop.f32.mrf.mxu0 }
  0xb3   :  { %v198_v3 = vpop.f32.mrf.mxu1  ;;  %v291_v11 = vpop.f32.mrf.mxu3 }
  0xb4   :  { %v199_v5 = vadd.f32 %v198_v3, %v97_v4 }
  0xb5   :  { %v252_v9 = vpop.f32.mrf.mxu2 }
  0xb6   :  { %v253_v10 = vadd.f32 %v252_v9, %v199_v5 }
  0xb8   :  { %v292_v14 = vadd.f32 %v291_v11, %v253_v10 }
  0xcb   :  { %v360_v15 = vpop.f32.mrf.mxu0 }
  0xcc   :  { %v361_v16 = vadd.f32 %v360_v15, %v292_v14 }
  0xd3   :  { %v397_v17 = vpop.f32.mrf.mxu1 }
  0xd4   :  { %v398_v19 = vadd.f32 %v397_v17, %v361_v16 }
  0xd6   :  { %400 = vst [vmem:[#allocation7] sm:$0xff] %v398_v19 }
  0xd7   :  { %411 = dma.vmem_to_hbm [thread:$0]  %s407_s1, 128, %s409_s23, [#allocation4]  }
  0xd8   :  { %500 = dma.done.wait [#allocation4], 128  }
  0xd9   :  { %501 = vsyncadd [#allocation4], 4294967168 }
  0xda   :  { %416 = vsyncpa [#allocation3], 1 }
  0xdb   :  { %417 = vsyncpa [#allocation6], 1 }
  0xdc   :  { %418 = vsyncpa [#allocation4], 1 }

</bundles_post_ra>
